<compile_context>
chip_gen: v6e
topology: v6e:2x2x1
jax: 0.10.0
libtpu: 0.0.40
codegen_flags: <defaults>
</compile_context>

<pallas_src>
import functools

import numpy as np
import jax
import jax.numpy as jnp
from jax import lax
from jax.experimental import pallas as pl
from jax.experimental.pallas import tpu as pltpu


# ----------------------------------------------------------------- host helpers
def bilinear_matrix(out_size: int, in_size: int) -> np.ndarray:
    """Interpolation matrix M (out_size, in_size) s.t. y = M @ x matches
    torch.nn.Upsample(mode='bilinear', align_corners=False) along one axis."""
    if in_size == 1:
        return np.ones((out_size, 1), np.float32)
    scale = in_size / out_size
    src = (np.arange(out_size, dtype=np.float64) + 0.5) * scale - 0.5
    src = np.clip(src, 0.0, in_size - 1)
    i0 = np.clip(np.floor(src).astype(np.int64), 0, in_size - 1)
    i1 = np.minimum(i0 + 1, in_size - 1)
    frac = (src - i0).astype(np.float32)
    m = np.zeros((out_size, in_size), np.float32)
    rows = np.arange(out_size)
    np.add.at(m, (rows, i0), 1.0 - frac)
    np.add.at(m, (rows, i1), frac)
    return m


def _conv_tap_masks(h: int, w: int) -> np.ndarray:
    """(9, h*w) 0/1 masks: tap k=(dy+1)*3+(dx+1) is valid at flattened position p iff
    the 3x3 (padding=1) source pixel (y+dy, x+dx) lies inside the image."""
    yy, xx = np.meshgrid(np.arange(h), np.arange(w), indexing="ij")
    yy = yy.reshape(-1)
    xx = xx.reshape(-1)
    masks = np.zeros((9, h * w), np.float32)
    k = 0
    for dy in (-1, 0, 1):
        for dx in (-1, 0, 1):
            valid = (yy + dy >= 0) & (yy + dy < h) & (xx + dx >= 0) & (xx + dx < w)
            masks[k] = valid.astype(np.float32)
            k += 1
    return masks


def _round_up(v: int, m: int) -> int:
    return (v + m - 1) // m * m


def _choose_col_tile(total: int, k_rows: int, itemsize: int,
                     max_tile_bytes: int = 4 * 2 ** 20) -> int:
    """Output-column tile for the fused path: a lane-dense divisor of `total`
    (preferring multiples of 256 for the 256-wide v6e/v7x MXU, then 128) that yields
    >= 2 grid steps (v7x megacore) and keeps the per-step W column slab bounded."""
    cap = max(128, max_tile_bytes // max(1, k_rows * itemsize))
    for lane_mult in (256, 128):
        if total % lane_mult:
            continue
        start = (min(total // 2, cap) // lane_mult) * lane_mult
        for t in range(start, 0, -lane_mult):
            if total % t == 0:
                return t
    return total


def _build_fused_operator(conv_w, conv_b, h_in, w_in, h_out, w_out, upsample_first):
    """Compose bilinear resize and 3x3 conv(+bias) into a single affine map
    y_flat = x_flat @ W_full + b_full.  The per-channel bias commutes with the resize
    (bilinear rows sum to 1), so b_full is the bias broadcast over output pixels for
    BOTH branch orders."""
    cout, cin = conv_w.shape[0], conv_w.shape[1]
    p_in, p_out = h_in * w_in, h_out * w_out
    wh = jnp.asarray(bilinear_matrix(h_out, h_in))   # (h_out, h_in)
    ww = jnp.asarray(bilinear_matrix(w_out, w_in))   # (w_out, w_in)

    def conv(z):
        return lax.conv_general_dilated(
            z, conv_w, window_strides=(1, 1), padding=((1, 1), (1, 1)),
            dimension_numbers=("NCHW", "OIHW", "NCHW"))

    def up(z):
        return jnp.einsum("oh,nchw,pw->ncop", wh, z, ww)

    # Apply the (bias-free) linear composition to the canonical basis of the input.
    basis = jnp.eye(cin * p_in, dtype=jnp.float32).reshape(cin * p_in, cin, h_in, w_in)
    cols = conv(up(basis)) if upsample_first else up(conv(basis))
    w_full = cols.reshape(cin * p_in, cout * p_out)
    b_full = jnp.broadcast_to(conv_b.astype(jnp.float32)[:, None],
                              (cout, p_out)).reshape(1, cout * p_out)
    return w_full, b_full


# ------------------------------------------------------------------ fused path
def _fused_kernel(x_ref, w_ref, b_ref, o_ref):
    # One MXU matmul per output-column tile: (N, K) @ (K, col_tile), f32 accumulation,
    # plus a single bias add and a full-lane unmasked store.
    acc = jnp.dot(x_ref[...], w_ref[...], preferred_element_type=jnp.float32)
    o_ref[...] = (acc + b_ref[...]).astype(o_ref.dtype)


def _deconv_fused(x, conv_w, conv_b, size, upsample_first, compute_dtype):
    n, cin, h_in, w_in = x.shape
    cout = conv_w.shape[0]
    h_out, w_out = size
    k_dim = cin * h_in * w_in
    np_dim = cout * h_out * w_out
    itemsize = jnp.dtype(compute_dtype).itemsize

    # TODO(synk): in deployment W_full/b_full are a once-per-weights precompute done at
    # module init; they are (re)built inside the jitted wrapper here to stay self-contained.
    w_full, b_full = _build_fused_operator(conv_w, conv_b, h_in, w_in,
                                           h_out, w_out, upsample_first)
    w_full = w_full.astype(compute_dtype)
    x2d = x.reshape(n, k_dim).astype(compute_dtype)   # wrapper reshape: layout plumbing only

    col_tile = _choose_col_tile(np_dim, k_dim, itemsize)
    grid = (np_dim // col_tile,)

    # Shape-derived VMEM budget (review: no pinned constant; stay well under v7x's 64 MiB).
    est = (n * k_dim * itemsize                 # x (resident: constant index_map)
           + 2 * k_dim * col_tile * itemsize    # W column slab, double-buffered
           + 2 * col_tile * 4                   # bias tile
           + 2 * n * col_tile * 4)              # output tile
    vmem_limit = int(min(48 * 2 ** 20, max(16 * 2 ** 20, 3 * est)))

    out2d = pl.pallas_call(
        _fused_kernel,
        out_shape=jax.ShapeDtypeStruct((n, np_dim), jnp.float32),
        grid_spec=pltpu.PrefetchScalarGridSpec(
            num_scalar_prefetch=0,
            grid=grid,
            in_specs=[
                pl.BlockSpec((n, k_dim), lambda j: (0, 0)),         # whole (small) input stays resident
                pl.BlockSpec((k_dim, col_tile), lambda j: (0, j)),  # stream W column tiles
                pl.BlockSpec((1, col_tile), lambda j: (0, j)),
            ],
            out_specs=pl.BlockSpec((n, col_tile), lambda j: (0, j)),
        ),
        compiler_params=pltpu.CompilerParams(
            dimension_semantics=("parallel",),
            vmem_limit_bytes=vmem_limit,
        ),
    )(x2d, w_full, b_full)
    return out2d.reshape(n, cout, h_out, w_out)


# ---------------------------------------------------------------- unfused path
def _make_unfused_kernel(conv_w_dim, upsample_first, compute_dtype):
    shifts = [dy * conv_w_dim + dx for dy in (-1, 0, 1) for dx in (-1, 0, 1)]

    def conv3x3(z, wmat, bias, masks, p_conv):
        # z: (cin_pad, p_conv) f32 conv input (one image, channels in sublanes).
        # 9 statically shifted taps via the XLU lane-rotate, zeroed at image borders by
        # precomputed 0/1 masks, stacked into one (9*cin_pad, p_conv) slab and hit with a
        # single wide-N MXU matmul (no per-batch / per-channel mini-matmuls), + one bias add.
        taps = []
        for k, s in enumerate(shifts):
            r = z if s == 0 else pltpu.roll(z, (-s) % p_conv, axis=1)
            taps.append(r * masks[k:k + 1, :])
        slab = jnp.concatenate(taps, axis=0).astype(compute_dtype)   # (9*cin_pad, p_conv)
        return jnp.dot(wmat, slab, preferred_element_type=jnp.float32) + bias

    def kernel(x_ref, u_ref, w_ref, b_ref, m_ref, o_ref):
        z = x_ref[...].astype(jnp.float32)   # (cin_pad, p_in)   full 8-sublane tile
        u = u_ref[...]                       # (p_in, p_out)     kron(Wh, Ww) resize matrix
        wmat = w_ref[...]                    # (cout_pad, 9*cin_pad) im2col conv weights
        bias = b_ref[...]                    # (cout_pad, 1) f32
        masks = m_ref[...]                   # (9, p_conv) f32
        p_conv = masks.shape[1]
        if upsample_first:
            up = jnp.dot(z.astype(compute_dtype), u, preferred_element_type=jnp.float32)
            out = conv3x3(up, wmat, bias, masks, p_conv)            # (cout_pad, p_out)
        else:
            c = conv3x3(z, wmat, bias, masks, p_conv)               # (cout_pad, p_in)
            out = jnp.dot(c.astype(compute_dtype), u, preferred_element_type=jnp.float32)
        o_ref[...] = out.astype(o_ref.dtype)                        # lane-dense, 8-aligned store

    return kernel


def _deconv_unfused(x, conv_w, conv_b, size, upsample_first, compute_dtype):
    n, cin, h_in, w_in = x.shape
    cout = conv_w.shape[0]
    h_out, w_out = size
    p_in, p_out = h_in * w_in, h_out * w_out
    conv_h, conv_wd = (h_out, w_out) if upsample_first else (h_in, w_in)
    p_conv = conv_h * conv_wd
    cin_pad, cout_pad = _round_up(cin, 8), _round_up(cout, 8)
    itemsize = jnp.dtype(compute_dtype).itemsize

    # Host-side constants: kron resize matrix, 8-padded im2col weights / bias, tap masks.
    wh = bilinear_matrix(h_out, h_in)
    ww = bilinear_matrix(w_out, w_in)
    u = jnp.asarray(np.kron(wh.T, ww.T)).astype(compute_dtype)               # (p_in, p_out)
    w4 = jnp.pad(conv_w.astype(jnp.float32),
                 ((0, cout_pad - cout), (0, cin_pad - cin), (0, 0), (0, 0)))
    wmat = w4.transpose(0, 2, 3, 1).reshape(cout_pad, 9 * cin_pad).astype(compute_dtype)
    bias = jnp.pad(conv_b.astype(jnp.float32), (0, cout_pad - cout)).reshape(cout_pad, 1)
    masks = jnp.asarray(_conv_tap_masks(conv_h, conv_wd))                    # (9, p_conv)

    # 2-D lane-dense layout: all pads / reshapes live in the wrapper (XLA layout plumbing);
    # the kernel sees full (8 x lane-dense) tiles and performs no reshape of its own.
    x2d = jnp.pad(x, ((0, 0), (0, cin_pad - cin), (0, 0), (0, 0))).reshape(n * cin_pad, p_in)

    est = ((cin_pad * p_in + cout_pad * p_out) * 4 * 2                       # x / out blocks
           + (p_in * p_out + cout_pad * 9 * cin_pad) * itemsize * 2          # constants
           + (9 * p_conv + cout_pad) * 4 * 2
           + (9 * cin_pad * p_conv + cin_pad * p_out + cout_pad * p_conv) * 4)  # temporaries
    vmem_limit = int(min(48 * 2 ** 20, max(16 * 2 ** 20, 3 * est)))

    kernel = _make_unfused_kernel(conv_wd, upsample_first, compute_dtype)

    out2d = pl.pallas_call(
        kernel,
        out_shape=jax.ShapeDtypeStruct((n * cout_pad, p_out), jnp.float32),
        grid_spec=pltpu.PrefetchScalarGridSpec(
            num_scalar_prefetch=0,
            grid=(n,),   # one image per step; batch axis sharded across TCs on v7x
            in_specs=[
                pl.BlockSpec((cin_pad, p_in), lambda b: (b, 0)),
                pl.BlockSpec((p_in, p_out), lambda b: (0, 0)),
                pl.BlockSpec((cout_pad, 9 * cin_pad), lambda b: (0, 0)),
                pl.BlockSpec((cout_pad, 1), lambda b: (0, 0)),
                pl.BlockSpec((9, p_conv), lambda b: (0, 0)),
            ],
            out_specs=pl.BlockSpec((cout_pad, p_out), lambda b: (b, 0)),
        ),
        compiler_params=pltpu.CompilerParams(
            dimension_semantics=("parallel",),
            vmem_limit_bytes=vmem_limit,
        ),
    )(x2d, u, wmat, bias, masks)

    return out2d.reshape(n, cout_pad, h_out, w_out)[:, :cout]


# -------------------------------------------------------------------- dispatch
@functools.partial(jax.jit, static_argnames=("size", "compute_dtype",
                                             "fused_w_bytes_limit", "force_unfused"))
def deconv_forward(x, conv_w, conv_b, size, compute_dtype=jnp.float32,
                   fused_w_bytes_limit=8 * 2 ** 20, force_unfused=False):
    """Deconv forward (2-D / bilinear).  x: (N, Cin, Hin, Win); conv_w: (Cout, Cin, 3, 3);
    conv_b: (Cout,); size: static (Hout, Wout).  compute_dtype=jnp.bfloat16 runs the MXU
    matmuls on bf16 operands with f32 accumulation."""
    n, cin, h_in, w_in = x.shape
    cout = conv_w.shape[0]
    h_out, w_out = size
    upsample_first = (h_in * w_in) / (h_out * w_out) < 1.0   # torch module's ratio rule

    fused_bytes = (cin * h_in * w_in) * (cout * h_out * w_out) * jnp.dtype(compute_dtype).itemsize
    if (not force_unfused) and fused_bytes <= fused_w_bytes_limit:
        return _deconv_fused(x, conv_w, conv_b, size, upsample_first, compute_dtype)
    return _deconv_unfused(x, conv_w, conv_b, size, upsample_first, compute_dtype)


# ------------------------------------------------------------------- reference
def reference_forward(x, conv_w, conv_b, size):
    """Plain-JAX reference with identical semantics (validation only)."""
    h_in, w_in = x.shape[-2:]
    h_out, w_out = size
    wh = jnp.asarray(bilinear_matrix(h_out, h_in))
    ww = jnp.asarray(bilinear_matrix(w_out, w_in))

    def conv(z):
        y = lax.conv_general_dilated(
            z, conv_w, window_strides=(1, 1), padding=((1, 1), (1, 1)),
            dimension_numbers=("NCHW", "OIHW", "NCHW"))
        return y + conv_b[None, :, None, None]

    def up(z):
        return jnp.einsum("oh,nchw,pw->ncop", wh, z, ww)

    if (h_in * w_in) / (h_out * w_out) < 1.0:
        return conv(up(x))
    return up(conv(x))


if __name__ == "__main__":
    key = jax.random.PRNGKey(0)
    kx1, kx2, kw, kb = jax.random.split(key, 4)

    CIN, COUT = 4, 4
    conv_w = jax.random.normal(kw, (COUT, CIN, 3, 3), dtype=jnp.float32) * 0.1
    conv_b = jax.random.normal(kb, (COUT,), dtype=jnp.float32) * 0.1

    # ratio < 1  -> upsample-then-conv;   ratio >= 1 -> conv-then-upsample.
    x_up = jax.random.normal(kx1, (2, CIN, 8, 8), dtype=jnp.float32)
    x_dn = jax.random.normal(kx2, (2, CIN, 16, 16), dtype=jnp.float32)

    cases = [
        ("fused/upsample-first", x_up, (16, 16), {}, 1e-3),
        ("fused/conv-first", x_dn, (8, 8), {}, 1e-3),
        ("unfused/upsample-first", x_up, (16, 16), {"force_unfused": True}, 1e-3),
        ("unfused/conv-first", x_dn, (8, 8), {"force_unfused": True}, 1e-3),
        ("fused/upsample-first/bf16", x_up, (16, 16), {"compute_dtype": jnp.bfloat16}, 5e-2),
    ]
    for name, xx, size, kwargs, tol in cases:
        out = jax.block_until_ready(deconv_forward(xx, conv_w, conv_b, size, **kwargs))
        ref = reference_forward(xx, conv_w, conv_b, size)
        assert out.shape == ref.shape, (name, out.shape, ref.shape)
        err = float(np.max(np.abs(np.asarray(out) - np.asarray(ref))))
        assert err <= tol, f"{name}: max abs err {err}"
    print("KERNEL_OK")
</pallas_src>

<mosaic_0001>
module attributes {stable_mosaic.version = 11 : i64} {
  func.func @_fused_kernel(%arg0: i32, %arg1: memref<2x256xf32, #tpu.memory_space<vmem>>, %arg2: memref<256x512xf32, #tpu.memory_space<vmem>>, %arg3: memref<1x512xf32, #tpu.memory_space<vmem>>, %arg4: memref<2x512xf32, #tpu.memory_space<vmem>>) attributes {dimension_semantics = [#tpu.dimension_semantics<parallel>], iteration_bounds = array<i64: 2>, scalar_prefetch = 0 : i64, scratch_operands = 0 : i64, tpu.core_type = #tpu.core_type<tc>, window_params = [{pipeline_mode = #tpu.pipeline_mode<synchronous>, transform_indices = @transform_0, window_bounds = array<i64: 2, 256>}, {transform_indices = @transform_1, window_bounds = array<i64: 256, 512>}, {transform_indices = @transform_2, window_bounds = array<i64: 1, 512>}, {transform_indices = @transform_3, window_bounds = array<i64: 2, 512>}]} {
    %c0 = arith.constant 0 : index
    %c0_0 = arith.constant 0 : index
    %0 = vector.load %arg1[%c0, %c0_0] : memref<2x256xf32, #tpu.memory_space<vmem>>, vector<2x256xf32>
    %c0_1 = arith.constant 0 : index
    %c0_2 = arith.constant 0 : index
    %1 = vector.load %arg2[%c0_1, %c0_2] : memref<256x512xf32, #tpu.memory_space<vmem>>, vector<256x512xf32>
    %cst = arith.constant dense<0.000000e+00> : vector<2x512xf32>
    %2 = tpu.matmul %0, %1, %cst {dimension_numbers = #tpu.dot_dimension_numbers<[1], [0], [0], [1], [0, 0, 1, 1], [], []>} : vector<2x256xf32>, vector<256x512xf32>, vector<2x512xf32> -> vector<2x512xf32>
    %c0_3 = arith.constant 0 : index
    %c0_4 = arith.constant 0 : index
    %3 = vector.load %arg3[%c0_3, %c0_4] : memref<1x512xf32, #tpu.memory_space<vmem>>, vector<1x512xf32>
    %4 = vector.broadcast %3 : vector<1x512xf32> to vector<2x512xf32>
    %5 = arith.addf %2, %4 : vector<2x512xf32>
    %c0_5 = arith.constant 0 : index
    %c0_6 = arith.constant 0 : index
    %6 = vector.load %arg4[%c0_5, %c0_6] : memref<2x512xf32, #tpu.memory_space<vmem>>, vector<2x512xf32>
    tpu.vector_store %arg4[%c0_5, %c0_6], %5 {strides = array<i32>} : memref<2x512xf32, #tpu.memory_space<vmem>>, vector<2x512xf32>,
    return
  }
  func.func @transform_0(%arg0: i32) -> (i32, i32) {
    %c0_i32 = arith.constant 0 : i32
    %c0_i32_0 = arith.constant 0 : i32
    %c0_i32_1 = arith.constant 0 : i32
    return %c0_i32, %c0_i32_0 : i32, i32
  }
  func.func @transform_1(%arg0: i32) -> (i32, i32) {
    %c0_i32 = arith.constant 0 : i32
    %c0_i32_0 = arith.constant 0 : i32
    return %c0_i32, %arg0 : i32, i32
  }
  func.func @transform_2(%arg0: i32) -> (i32, i32) {
    %c0_i32 = arith.constant 0 : i32
    %c0_i32_0 = arith.constant 0 : i32
    return %c0_i32, %arg0 : i32, i32
  }
  func.func @transform_3(%arg0: i32) -> (i32, i32) {
    %c0_i32 = arith.constant 0 : i32
    %c0_i32_0 = arith.constant 0 : i32
    return %c0_i32, %arg0 : i32, i32
  }
}

</mosaic_0001>

<bundles_post_ra>
// kernel: deconv_forward.1
= control target key start
LH: loop header
LB: loop body
LE: loop exit
PB: predicated region body
PF: predicated region fallthrough
CT: control target
= control target key end

     0   :  { %s950_s12 = smov 0   ;;  %s952_s13 = smov 0   ;;  %s1408_s0 = inlined_call_operand.vmem [shape: f32[2,256], index: 0, kind: input, shape index: {}]   ;;  %s1409_s1 = inlined_call_operand.vmem [shape: f32[256,1024], index: 1, kind: input, shape index: {}]   ;;  %s1410_s2 = inlined_call_operand.vmem [shape: f32[1,1024], index: 2, kind: input, shape index: {}]   ;;  %s1411_s3 = inlined_call_operand.vmem [shape: f32[2,1024], index: 3, kind: output, shape index: {}]  }
   0x1   :  { %s954_s14 = smov 0  }
   0x2 LB: > { %s864_s15 = sadd.s32 4294967295, %s927_s14   ;;  %s967_s16 = sadd.s32 1, %s927_s14   ;;  %s927_s14 = sphi %s954_s14, %s1414_s14   ;;  %s923_s13 = sphi %s952_s13, %s1413_s13   ;;  %s919_s12 = sphi %s950_s12, %s1412_s12  }
   0x3   : > { %s38_s17 = ssub.s32 %s927_s14, %s967_s16  ;;  %s41_s18 = sadd.s32 1, %s923_s13 }
   0x4   : > { %p39_p0 = scmp.eq.s32.totalorder %s38_s17, 0  ;;  %p48_p1 = scmp.ne.s32.totalorder %s923_s13, %s919_s12 }
   0x5   : > { %p49_p2 = scmp.eq.s32.totalorder %s927_s14, 0  ;;  %p867_p4 = scmp.ge.s32.totalorder %s927_s14, 2 }
   0x6   : > { %s976_s19 = scalar_select %p39_p0, %s923_s13, %s41_s18  }
   0x7   : > { %p50_p3 = por %p49_p2, %p48_p1  ;;  %129 = sbr.rel (%p867_p4) target bundleno = 80 (0x50), region = 20 }
   0xc   : > { %132 = sbr.rel (!%p50_p3) target bundleno = 80 (0x50), region = 24  ;;  %s134_s20 = sand.u32 (%p50_p3), 1, %s923_s13  }
   0xd   : > { %s879_s21 = sshll.u32 (%p50_p3), %s927_s14, 5  ;;  %s868_s22 = sshll.u32 (%p50_p3), %s134_s20, 10 }
   0xe   : > { %s984_s25 = scalar_lea.vmem (%p50_p3), %s1409_s1, %s879_s21  ;;  %s989_s26 = scalar_lea.vmem (%p50_p3), [#allocation2], %s868_s22 }
   0xf   : > { %v152_v0 = vld [vmem:[%s984_s25] sm:$0xff] (%p50_p3)  ;;  %v154_v1 = vld [vmem:[%s984_s25 + $0x8] sm:$0xff] (%p50_p3)  ;;  %v156_v2 = vld [vmem:[%s984_s25 + $0x10] sm:$0xff] (%p50_p3) }
  0x10   : > { %153 = vst [vmem:[%s989_s26] sm:$0xff] (%p50_p3), %v152_v0  ;;  %155 = vst [vmem:[%s989_s26 + $0x8] sm:$0xff] (%p50_p3), %v154_v1  ;;  %v158_v3 = vld [vmem:[%s984_s25 + $0x18] sm:$0xff] (%p50_p3)  ;;  %v160_v4 = vld [vmem:[%s984_s25 + $0x40] sm:$0xff] (%p50_p3) }
  0x11   : > { %157 = vst [vmem:[%s989_s26 + $0x10] sm:$0xff] %v156_v2  ;;  %v162_v5 = vld [vmem:[%s984_s25 + $0x48] sm:$0xff]  ;;  %159 = vst [vmem:[%s989_s26 + $0x18] sm:$0xff] %v158_v3  ;;  %v164_v6 = vld [vmem:[%s984_s25 + $0x50] sm:$0xff] }
  0x12   : > { %161 = vst [vmem:[%s989_s26 + $0x20] sm:$0xff] %v160_v4  ;;  %163 = vst [vmem:[%s989_s26 + $0x28] sm:$0xff] %v162_v5  ;;  %v166_v7 = vld [vmem:[%s984_s25 + $0x58] sm:$0xff]  ;;  %v168_v8 = vld [vmem:[%s984_s25 + $0x80] sm:$0xff] }
  0x13   : > { %165 = vst [vmem:[%s989_s26 + $0x30] sm:$0xff] %v164_v6  ;;  %167 = vst [vmem:[%s989_s26 + $0x38] sm:$0xff] %v166_v7  ;;  %v170_v9 = vld [vmem:[%s984_s25 + $0x88] sm:$0xff]  ;;  %v172_v10 = vld [vmem:[%s984_s25 + $0x90] sm:$0xff] }
  0x14   : > { %169 = vst [vmem:[%s989_s26 + $0x40] sm:$0xff] %v168_v8  ;;  %v174_v11 = vld [vmem:[%s984_s25 + $0x98] sm:$0xff]  ;;  %171 = vst [vmem:[%s989_s26 + $0x48] sm:$0xff] %v170_v9  ;;  %v176_v12 = vld [vmem:[%s984_s25 + $0xc0] sm:$0xff] }
  0x15   : > { %173 = vst [vmem:[%s989_s26 + $0x50] sm:$0xff] %v172_v10  ;;  %175 = vst [vmem:[%s989_s26 + $0x58] sm:$0xff] %v174_v11  ;;  %v178_v13 = vld [vmem:[%s984_s25 + $0xc8] sm:$0xff]  ;;  %v180_v14 = vld [vmem:[%s984_s25 + $0xd0] sm:$0xff] }
  0x16   : > { %177 = vst [vmem:[%s989_s26 + $0x60] sm:$0xff] %v176_v12  ;;  %179 = vst [vmem:[%s989_s26 + $0x68] sm:$0xff] %v178_v13  ;;  %v182_v15 = vld [vmem:[%s984_s25 + $0xd8] sm:$0xff]  ;;  %v184_v16 = vld [vmem:[%s984_s25 + $0x100] sm:$0xff] }
  0x17   : > { %181 = vst [vmem:[%s989_s26 + $0x70] sm:$0xff] %v180_v14  ;;  %v186_v17 = vld [vmem:[%s984_s25 + $0x108] sm:$0xff]  ;;  %183 = vst [vmem:[%s989_s26 + $0x78] sm:$0xff] %v182_v15  ;;  %v188_v18 = vld [vmem:[%s984_s25 + $0x110] sm:$0xff] }
  0x18   : > { %185 = vst [vmem:[%s989_s26 + $0x80] sm:$0xff] %v184_v16  ;;  %187 = vst [vmem:[%s989_s26 + $0x88] sm:$0xff] %v186_v17  ;;  %v190_v19 = vld [vmem:[%s984_s25 + $0x118] sm:$0xff]  ;;  %v192_v20 = vld [vmem:[%s984_s25 + $0x140] sm:$0xff] }
  0x19   : > { %189 = vst [vmem:[%s989_s26 + $0x90] sm:$0xff] %v188_v18  ;;  %191 = vst [vmem:[%s989_s26 + $0x98] sm:$0xff] %v190_v19  ;;  %v194_v21 = vld [vmem:[%s984_s25 + $0x148] sm:$0xff]  ;;  %v196_v22 = vld [vmem:[%s984_s25 + $0x150] sm:$0xff] }
  0x1a   : > { %193 = vst [vmem:[%s989_s26 + $0xa0] sm:$0xff] %v192_v20  ;;  %v198_v23 = vld [vmem:[%s984_s25 + $0x158] sm:$0xff]  ;;  %195 = vst [vmem:[%s989_s26 + $0xa8] sm:$0xff] %v194_v21  ;;  %v200_v24 = vld [vmem:[%s984_s25 + $0x180] sm:$0xff] }
  0x1b   : > { %197 = vst [vmem:[%s989_s26 + $0xb0] sm:$0xff] %v196_v22  ;;  %199 = vst [vmem:[%s989_s26 + $0xb8] sm:$0xff] %v198_v23  ;;  %v202_v25 = vld [vmem:[%s984_s25 + $0x188] sm:$0xff]  ;;  %v204_v26 = vld [vmem:[%s984_s25 + $0x190] sm:$0xff] }
  0x1c   : > { %201 = vst [vmem:[%s989_s26 + $0xc0] sm:$0xff] %v200_v24  ;;  %203 = vst [vmem:[%s989_s26 + $0xc8] sm:$0xff] %v202_v25  ;;  %v206_v27 = vld [vmem:[%s984_s25 + $0x198] sm:$0xff]  ;;  %v208_v28 = vld [vmem:[%s984_s25 + $0x1c0] sm:$0xff] }
  0x1d   : > { %205 = vst [vmem:[%s989_s26 + $0xd0] sm:$0xff] %v204_v26  ;;  %v210_v29 = vld [vmem:[%s984_s25 + $0x1c8] sm:$0xff]  ;;  %207 = vst [vmem:[%s989_s26 + $0xd8] sm:$0xff] %v206_v27  ;;  %v212_v30 = vld [vmem:[%s984_s25 + $0x1d0] sm:$0xff] }
  0x1e   : > { %209 = vst [vmem:[%s989_s26 + $0xe0] sm:$0xff] %v208_v28  ;;  %211 = vst [vmem:[%s989_s26 + $0xe8] sm:$0xff] %v210_v29  ;;  %v214_v31 = vld [vmem:[%s984_s25 + $0x1d8] sm:$0xff]  ;;  %v216_v32 = vld [vmem:[%s984_s25 + $0x200] sm:$0xff] }
  0x1f   : > { %213 = vst [vmem:[%s989_s26 + $0xf0] sm:$0xff] %v212_v30  ;;  %215 = vst [vmem:[%s989_s26 + $0xf8] sm:$0xff] %v214_v31  ;;  %v218_v33 = vld [vmem:[%s984_s25 + $0x208] sm:$0xff]  ;;  %v220_v34 = vld [vmem:[%s984_s25 + $0x210] sm:$0xff] }
  0x20   : > { %217 = vst [vmem:[%s989_s26 + $0x100] sm:$0xff] %v216_v32  ;;  %v222_v35 = vld [vmem:[%s984_s25 + $0x218] sm:$0xff]  ;;  %219 = vst [vmem:[%s989_s26 + $0x108] sm:$0xff] %v218_v33  ;;  %v224_v36 = vld [vmem:[%s984_s25 + $0x240] sm:$0xff] }
  0x21   : > { %221 = vst [vmem:[%s989_s26 + $0x110] sm:$0xff] %v220_v34  ;;  %223 = vst [vmem:[%s989_s26 + $0x118] sm:$0xff] %v222_v35  ;;  %v226_v37 = vld [vmem:[%s984_s25 + $0x248] sm:$0xff]  ;;  %v228_v38 = vld [vmem:[%s984_s25 + $0x250] sm:$0xff] }
  0x22   : > { %225 = vst [vmem:[%s989_s26 + $0x120] sm:$0xff] %v224_v36  ;;  %227 = vst [vmem:[%s989_s26 + $0x128] sm:$0xff] %v226_v37  ;;  %v230_v39 = vld [vmem:[%s984_s25 + $0x258] sm:$0xff]  ;;  %v232_v40 = vld [vmem:[%s984_s25 + $0x280] sm:$0xff] }
  0x23   : > { %229 = vst [vmem:[%s989_s26 + $0x130] sm:$0xff] %v228_v38  ;;  %v234_v41 = vld [vmem:[%s984_s25 + $0x288] sm:$0xff]  ;;  %231 = vst [vmem:[%s989_s26 + $0x138] sm:$0xff] %v230_v39  ;;  %v236_v42 = vld [vmem:[%s984_s25 + $0x290] sm:$0xff] }
  0x24   : > { %233 = vst [vmem:[%s989_s26 + $0x140] sm:$0xff] %v232_v40  ;;  %235 = vst [vmem:[%s989_s26 + $0x148] sm:$0xff] %v234_v41  ;;  %v238_v43 = vld [vmem:[%s984_s25 + $0x298] sm:$0xff]  ;;  %v240_v44 = vld [vmem:[%s984_s25 + $0x2c0] sm:$0xff] }
  0x25   : > { %237 = vst [vmem:[%s989_s26 + $0x150] sm:$0xff] %v236_v42  ;;  %239 = vst [vmem:[%s989_s26 + $0x158] sm:$0xff] %v238_v43  ;;  %v242_v45 = vld [vmem:[%s984_s25 + $0x2c8] sm:$0xff]  ;;  %v244_v46 = vld [vmem:[%s984_s25 + $0x2d0] sm:$0xff] }
  0x26   : > { %241 = vst [vmem:[%s989_s26 + $0x160] sm:$0xff] %v240_v44  ;;  %v246_v47 = vld [vmem:[%s984_s25 + $0x2d8] sm:$0xff]  ;;  %243 = vst [vmem:[%s989_s26 + $0x168] sm:$0xff] %v242_v45  ;;  %v248_v48 = vld [vmem:[%s984_s25 + $0x300] sm:$0xff] }
  0x27   : > { %245 = vst [vmem:[%s989_s26 + $0x170] sm:$0xff] %v244_v46  ;;  %247 = vst [vmem:[%s989_s26 + $0x178] sm:$0xff] %v246_v47  ;;  %v250_v49 = vld [vmem:[%s984_s25 + $0x308] sm:$0xff]  ;;  %v252_v50 = vld [vmem:[%s984_s25 + $0x310] sm:$0xff] }
  0x28   : > { %249 = vst [vmem:[%s989_s26 + $0x180] sm:$0xff] %v248_v48  ;;  %251 = vst [vmem:[%s989_s26 + $0x188] sm:$0xff] %v250_v49  ;;  %v254_v51 = vld [vmem:[%s984_s25 + $0x318] sm:$0xff]  ;;  %v256_v52 = vld [vmem:[%s984_s25 + $0x340] sm:$0xff] }
  0x29   : > { %253 = vst [vmem:[%s989_s26 + $0x190] sm:$0xff] %v252_v50  ;;  %v258_v53 = vld [vmem:[%s984_s25 + $0x348] sm:$0xff]  ;;  %255 = vst [vmem:[%s989_s26 + $0x198] sm:$0xff] %v254_v51  ;;  %v260_v54 = vld [vmem:[%s984_s25 + $0x350] sm:$0xff] }
  0x2a   : > { %257 = vst [vmem:[%s989_s26 + $0x1a0] sm:$0xff] %v256_v52  ;;  %259 = vst [vmem:[%s989_s26 + $0x1a8] sm:$0xff] %v258_v53  ;;  %v262_v55 = vld [vmem:[%s984_s25 + $0x358] sm:$0xff]  ;;  %v264_v56 = vld [vmem:[%s984_s25 + $0x380] sm:$0xff] }
  0x2b   : > { %261 = vst [vmem:[%s989_s26 + $0x1b0] sm:$0xff] %v260_v54  ;;  %263 = vst [vmem:[%s989_s26 + $0x1b8] sm:$0xff] %v262_v55  ;;  %v266_v57 = vld [vmem:[%s984_s25 + $0x388] sm:$0xff]  ;;  %v268_v58 = vld [vmem:[%s984_s25 + $0x390] sm:$0xff] }
  0x2c   : > { %265 = vst [vmem:[%s989_s26 + $0x1c0] sm:$0xff] %v264_v56  ;;  %v270_v59 = vld [vmem:[%s984_s25 + $0x398] sm:$0xff]  ;;  %267 = vst [vmem:[%s989_s26 + $0x1c8] sm:$0xff] %v266_v57  ;;  %v272_v60 = vld [vmem:[%s984_s25 + $0x3c0] sm:$0xff] }
  0x2d   : > { %269 = vst [vmem:[%s989_s26 + $0x1d0] sm:$0xff] %v268_v58  ;;  %271 = vst [vmem:[%s989_s26 + $0x1d8] sm:$0xff] %v270_v59  ;;  %v274_v61 = vld [vmem:[%s984_s25 + $0x3c8] sm:$0xff]  ;;  %v276_v62 = vld [vmem:[%s984_s25 + $0x3d0] sm:$0xff] }
  0x2e   : > { %273 = vst [vmem:[%s989_s26 + $0x1e0] sm:$0xff] %v272_v60  ;;  %275 = vst [vmem:[%s989_s26 + $0x1e8] sm:$0xff] %v274_v61  ;;  %v278_v63 = vld [vmem:[%s984_s25 + $0x3d8] sm:$0xff]  ;;  %v280_v0 = vld [vmem:[%s984_s25 + $0x400] sm:$0xff] }
  0x2f   : > { %277 = vst [vmem:[%s989_s26 + $0x1f0] sm:$0xff] %v276_v62  ;;  %v282_v1 = vld [vmem:[%s984_s25 + $0x408] sm:$0xff]  ;;  %279 = vst [vmem:[%s989_s26 + $0x1f8] sm:$0xff] %v278_v63  ;;  %v284_v2 = vld [vmem:[%s984_s25 + $0x410] sm:$0xff] }
  0x30   : > { %281 = vst [vmem:[%s989_s26 + $0x200] sm:$0xff] %v280_v0  ;;  %283 = vst [vmem:[%s989_s26 + $0x208] sm:$0xff] %v282_v1  ;;  %v286_v3 = vld [vmem:[%s984_s25 + $0x418] sm:$0xff]  ;;  %v288_v4 = vld [vmem:[%s984_s25 + $0x440] sm:$0xff] }
  0x31   : > { %285 = vst [vmem:[%s989_s26 + $0x210] sm:$0xff] %v284_v2  ;;  %287 = vst [vmem:[%s989_s26 + $0x218] sm:$0xff] %v286_v3  ;;  %v290_v5 = vld [vmem:[%s984_s25 + $0x448] sm:$0xff]  ;;  %v292_v6 = vld [vmem:[%s984_s25 + $0x450] sm:$0xff] }
  0x32   : > { %289 = vst [vmem:[%s989_s26 + $0x220] sm:$0xff] %v288_v4  ;;  %v294_v7 = vld [vmem:[%s984_s25 + $0x458] sm:$0xff]  ;;  %291 = vst [vmem:[%s989_s26 + $0x228] sm:$0xff] %v290_v5  ;;  %v296_v8 = vld [vmem:[%s984_s25 + $0x480] sm:$0xff] }
  0x33   : > { %293 = vst [vmem:[%s989_s26 + $0x230] sm:$0xff] %v292_v6  ;;  %295 = vst [vmem:[%s989_s26 + $0x238] sm:$0xff] %v294_v7  ;;  %v298_v9 = vld [vmem:[%s984_s25 + $0x488] sm:$0xff]  ;;  %v300_v10 = vld [vmem:[%s984_s25 + $0x490] sm:$0xff] }
  0x34   : > { %297 = vst [vmem:[%s989_s26 + $0x240] sm:$0xff] %v296_v8  ;;  %299 = vst [vmem:[%s989_s26 + $0x248] sm:$0xff] %v298_v9  ;;  %v302_v11 = vld [vmem:[%s984_s25 + $0x498] sm:$0xff]  ;;  %v304_v12 = vld [vmem:[%s984_s25 + $0x4c0] sm:$0xff] }
  0x35   : > { %301 = vst [vmem:[%s989_s26 + $0x250] sm:$0xff] %v300_v10  ;;  %v306_v13 = vld [vmem:[%s984_s25 + $0x4c8] sm:$0xff]  ;;  %303 = vst [vmem:[%s989_s26 + $0x258] sm:$0xff] %v302_v11  ;;  %v308_v14 = vld [vmem:[%s984_s25 + $0x4d0] sm:$0xff] }
  0x36   : > { %305 = vst [vmem:[%s989_s26 + $0x260] sm:$0xff] %v304_v12  ;;  %307 = vst [vmem:[%s989_s26 + $0x268] sm:$0xff] %v306_v13  ;;  %v310_v15 = vld [vmem:[%s984_s25 + $0x4d8] sm:$0xff]  ;;  %v312_v16 = vld [vmem:[%s984_s25 + $0x500] sm:$0xff] }
  0x37   : > { %309 = vst [vmem:[%s989_s26 + $0x270] sm:$0xff] %v308_v14  ;;  %311 = vst [vmem:[%s989_s26 + $0x278] sm:$0xff] %v310_v15  ;;  %v314_v17 = vld [vmem:[%s984_s25 + $0x508] sm:$0xff]  ;;  %v316_v18 = vld [vmem:[%s984_s25 + $0x510] sm:$0xff] }
  0x38   : > { %313 = vst [vmem:[%s989_s26 + $0x280] sm:$0xff] %v312_v16  ;;  %v318_v19 = vld [vmem:[%s984_s25 + $0x518] sm:$0xff]  ;;  %315 = vst [vmem:[%s989_s26 + $0x288] sm:$0xff] %v314_v17  ;;  %v320_v20 = vld [vmem:[%s984_s25 + $0x540] sm:$0xff] }
  0x39   : > { %317 = vst [vmem:[%s989_s26 + $0x290] sm:$0xff] %v316_v18  ;;  %319 = vst [vmem:[%s989_s26 + $0x298] sm:$0xff] %v318_v19  ;;  %v322_v21 = vld [vmem:[%s984_s25 + $0x548] sm:$0xff]  ;;  %v324_v22 = vld [vmem:[%s984_s25 + $0x550] sm:$0xff] }
  0x3a   : > { %321 = vst [vmem:[%s989_s26 + $0x2a0] sm:$0xff] %v320_v20  ;;  %323 = vst [vmem:[%s989_s26 + $0x2a8] sm:$0xff] %v322_v21  ;;  %v326_v23 = vld [vmem:[%s984_s25 + $0x558] sm:$0xff]  ;;  %v328_v24 = vld [vmem:[%s984_s25 + $0x580] sm:$0xff] }
  0x3b   : > { %325 = vst [vmem:[%s989_s26 + $0x2b0] sm:$0xff] %v324_v22  ;;  %v330_v25 = vld [vmem:[%s984_s25 + $0x588] sm:$0xff]  ;;  %327 = vst [vmem:[%s989_s26 + $0x2b8] sm:$0xff] %v326_v23  ;;  %v332_v26 = vld [vmem:[%s984_s25 + $0x590] sm:$0xff] }
  0x3c   : > { %329 = vst [vmem:[%s989_s26 + $0x2c0] sm:$0xff] %v328_v24  ;;  %331 = vst [vmem:[%s989_s26 + $0x2c8] sm:$0xff] %v330_v25  ;;  %v334_v27 = vld [vmem:[%s984_s25 + $0x598] sm:$0xff]  ;;  %v336_v28 = vld [vmem:[%s984_s25 + $0x5c0] sm:$0xff] }
  0x3d   : > { %333 = vst [vmem:[%s989_s26 + $0x2d0] sm:$0xff] %v332_v26  ;;  %335 = vst [vmem:[%s989_s26 + $0x2d8] sm:$0xff] %v334_v27  ;;  %v338_v29 = vld [vmem:[%s984_s25 + $0x5c8] sm:$0xff]  ;;  %v340_v30 = vld [vmem:[%s984_s25 + $0x5d0] sm:$0xff] }
  0x3e   : > { %337 = vst [vmem:[%s989_s26 + $0x2e0] sm:$0xff] %v336_v28  ;;  %v342_v31 = vld [vmem:[%s984_s25 + $0x5d8] sm:$0xff]  ;;  %339 = vst [vmem:[%s989_s26 + $0x2e8] sm:$0xff] %v338_v29  ;;  %v344_v32 = vld [vmem:[%s984_s25 + $0x600] sm:$0xff] }
  0x3f   : > { %341 = vst [vmem:[%s989_s26 + $0x2f0] sm:$0xff] %v340_v30  ;;  %343 = vst [vmem:[%s989_s26 + $0x2f8] sm:$0xff] %v342_v31  ;;  %v346_v33 = vld [vmem:[%s984_s25 + $0x608] sm:$0xff]  ;;  %v348_v34 = vld [vmem:[%s984_s25 + $0x610] sm:$0xff] }
  0x40   : > { %345 = vst [vmem:[%s989_s26 + $0x300] sm:$0xff] %v344_v32  ;;  %347 = vst [vmem:[%s989_s26 + $0x308] sm:$0xff] %v346_v33  ;;  %v350_v35 = vld [vmem:[%s984_s25 + $0x618] sm:$0xff]  ;;  %v352_v36 = vld [vmem:[%s984_s25 + $0x640] sm:$0xff] }
  0x41   : > { %349 = vst [vmem:[%s989_s26 + $0x310] sm:$0xff] %v348_v34  ;;  %v354_v37 = vld [vmem:[%s984_s25 + $0x648] sm:$0xff]  ;;  %351 = vst [vmem:[%s989_s26 + $0x318] sm:$0xff] %v350_v35  ;;  %v356_v38 = vld [vmem:[%s984_s25 + $0x650] sm:$0xff] }
  0x42   : > { %353 = vst [vmem:[%s989_s26 + $0x320] sm:$0xff] %v352_v36  ;;  %355 = vst [vmem:[%s989_s26 + $0x328] sm:$0xff] %v354_v37  ;;  %v358_v39 = vld [vmem:[%s984_s25 + $0x658] sm:$0xff]  ;;  %v360_v40 = vld [vmem:[%s984_s25 + $0x680] sm:$0xff] }
  0x43   : > { %357 = vst [vmem:[%s989_s26 + $0x330] sm:$0xff] %v356_v38  ;;  %359 = vst [vmem:[%s989_s26 + $0x338] sm:$0xff] %v358_v39  ;;  %v362_v41 = vld [vmem:[%s984_s25 + $0x688] sm:$0xff]  ;;  %v364_v42 = vld [vmem:[%s984_s25 + $0x690] sm:$0xff] }
  0x44   : > { %361 = vst [vmem:[%s989_s26 + $0x340] sm:$0xff] %v360_v40  ;;  %v366_v43 = vld [vmem:[%s984_s25 + $0x698] sm:$0xff]  ;;  %363 = vst [vmem:[%s989_s26 + $0x348] sm:$0xff] %v362_v41  ;;  %v368_v44 = vld [vmem:[%s984_s25 + $0x6c0] sm:$0xff] }
  0x45   : > { %365 = vst [vmem:[%s989_s26 + $0x350] sm:$0xff] %v364_v42  ;;  %367 = vst [vmem:[%s989_s26 + $0x358] sm:$0xff] %v366_v43  ;;  %v370_v45 = vld [vmem:[%s984_s25 + $0x6c8] sm:$0xff]  ;;  %v372_v46 = vld [vmem:[%s984_s25 + $0x6d0] sm:$0xff] }
  0x46   : > { %369 = vst [vmem:[%s989_s26 + $0x360] sm:$0xff] %v368_v44  ;;  %371 = vst [vmem:[%s989_s26 + $0x368] sm:$0xff] %v370_v45  ;;  %v374_v47 = vld [vmem:[%s984_s25 + $0x6d8] sm:$0xff]  ;;  %v376_v48 = vld [vmem:[%s984_s25 + $0x700] sm:$0xff] }
  0x47   : > { %373 = vst [vmem:[%s989_s26 + $0x370] sm:$0xff] %v372_v46  ;;  %v378_v49 = vld [vmem:[%s984_s25 + $0x708] sm:$0xff]  ;;  %375 = vst [vmem:[%s989_s26 + $0x378] sm:$0xff] %v374_v47  ;;  %v380_v50 = vld [vmem:[%s984_s25 + $0x710] sm:$0xff] }
  0x48   : > { %377 = vst [vmem:[%s989_s26 + $0x380] sm:$0xff] %v376_v48  ;;  %379 = vst [vmem:[%s989_s26 + $0x388] sm:$0xff] %v378_v49  ;;  %v382_v51 = vld [vmem:[%s984_s25 + $0x718] sm:$0xff]  ;;  %v384_v52 = vld [vmem:[%s984_s25 + $0x740] sm:$0xff] }
  0x49   : > { %381 = vst [vmem:[%s989_s26 + $0x390] sm:$0xff] %v380_v50  ;;  %383 = vst [vmem:[%s989_s26 + $0x398] sm:$0xff] %v382_v51  ;;  %v386_v53 = vld [vmem:[%s984_s25 + $0x748] sm:$0xff]  ;;  %v388_v54 = vld [vmem:[%s984_s25 + $0x750] sm:$0xff] }
  0x4a   : > { %385 = vst [vmem:[%s989_s26 + $0x3a0] sm:$0xff] %v384_v52  ;;  %v390_v55 = vld [vmem:[%s984_s25 + $0x758] sm:$0xff]  ;;  %387 = vst [vmem:[%s989_s26 + $0x3a8] sm:$0xff] %v386_v53  ;;  %v392_v56 = vld [vmem:[%s984_s25 + $0x780] sm:$0xff] }
  0x4b   : > { %389 = vst [vmem:[%s989_s26 + $0x3b0] sm:$0xff] %v388_v54  ;;  %391 = vst [vmem:[%s989_s26 + $0x3b8] sm:$0xff] %v390_v55  ;;  %v394_v57 = vld [vmem:[%s984_s25 + $0x788] sm:$0xff]  ;;  %v396_v58 = vld [vmem:[%s984_s25 + $0x790] sm:$0xff] }
  0x4c   : > { %393 = vst [vmem:[%s989_s26 + $0x3c0] sm:$0xff] %v392_v56  ;;  %395 = vst [vmem:[%s989_s26 + $0x3c8] sm:$0xff] %v394_v57  ;;  %v398_v59 = vld [vmem:[%s984_s25 + $0x798] sm:$0xff]  ;;  %v400_v60 = vld [vmem:[%s984_s25 + $0x7c0] sm:$0xff] }
  0x4d   : > { %397 = vst [vmem:[%s989_s26 + $0x3d0] sm:$0xff] %v396_v58  ;;  %v402_v61 = vld [vmem:[%s984_s25 + $0x7c8] sm:$0xff]  ;;  %399 = vst [vmem:[%s989_s26 + $0x3d8] sm:$0xff] %v398_v59  ;;  %v404_v62 = vld [vmem:[%s984_s25 + $0x7d0] sm:$0xff] }
  0x4e   : > { %401 = vst [vmem:[%s989_s26 + $0x3e0] sm:$0xff] %v400_v60  ;;  %403 = vst [vmem:[%s989_s26 + $0x3e8] sm:$0xff] %v402_v61  ;;  %v406_v63 = vld [vmem:[%s984_s25 + $0x7d8] sm:$0xff] }
  0x4f   : > { %405 = vst [vmem:[%s989_s26 + $0x3f0] sm:$0xff] %v404_v62  ;;  %407 = vst [vmem:[%s989_s26 + $0x3f8] sm:$0xff] %v406_v63 }
  0x50 PF: > { %p871_p5 = scmp.ge.s32.totalorder %s927_s14, 1  ;;  %p420_p6 = scmp.lt.s32.totalorder %s927_s14, 3 }
  0x52   : > { %p421_p7 = pnand %p871_p5, %p420_p6 }
  0x53   : > { %s427_s27 = sand.u32 (!%p421_p7), 1, %s919_s12   ;;  %s873_s5 = sshll.u32 (!%p421_p7), %s864_s15, 2 }
  0x54   : > { %424 = sbr.rel (%p421_p7) target bundleno = 359 (0x167), region = 51  ;;  %s872_s30 = sshll.u32 (!%p421_p7), %s427_s27, 10 }
  0x55   : > { %s1254_s4 = scalar_lea.vmem (!%p421_p7), [#allocation2], %s872_s30  ;;  %p456_p8 = scmp.lt.s32.totalorder (!%p421_p7), %s873_s5, 7 }
  0x59   : > { %v1250_v0 = vld.sshfl [vmem:[%s1408_s0] sm:$0x33 pattern:$0x76325410]  ;;  %v528_v2 = vld [vmem:[%s1254_s4 + $0x1e8] sm:$0xff]  ;;  %v530_v3 = vld [vmem:[%s1254_s4 + $0x1f8] sm:$0xff] }
  0x5a   : > { %v625_v1 = vcombine.high %v1250_v0, %v1250_v0  ;;  %v527_v4 = vld [vmem:[%s1254_s4 + $0x1e0] sm:$0xff]  ;;  %628 = vmatprep.subr.mxu0 %v528_v2  ;;  %699 = vmatprep.subr.mxu1 %v530_v3  ;;  %v529_v5 = vld [vmem:[%s1254_s4 + $0x1f0] sm:$0xff]  ;;  %v524_v6 = vld [vmem:[%s1254_s4 + $0x1c8] sm:$0xff]  ;;  %s1416_s5 = smov (!%p456_p8, %s873_s5), 7 }
  0x5b   : > { %v526_v7 = vld [vmem:[%s1254_s4 + $0x1d8] sm:$0xff]  ;;  %629 = vmatpush1.msra.mxu0 %v527_v4  ;;  %700 = vmatpush1.msra.mxu1 %v529_v5  ;;  %v523_v8 = vld [vmem:[%s1254_s4 + $0x1c0] sm:$0xff]  ;;  %v525_v9 = vld [vmem:[%s1254_s4 + $0x1d0] sm:$0xff]  ;;  %s458_s8 = scalar_lea.vmem %s1410_s2, %s1416_s5  ;;  %s875_s9 = sshll.u32 %s1416_s5, 1 }
  0x5c   : > { %692 = vmatprep.mubr.f32.mxu0 %v625_v1  ;;  %763 = vmatprep.mubr.f32.mxu1 %v625_v1  ;;  %v520_v10 = vld [vmem:[%s1254_s4 + $0x1a8] sm:$0xff]  ;;  %v522_v11 = vld [vmem:[%s1254_s4 + $0x1b8] sm:$0xff]  ;;  %v519_v12 = vld [vmem:[%s1254_s4 + $0x1a0] sm:$0xff]  ;;  %s464_s12 = scalar_lea.vmem %s1411_s3, %s875_s9 }
  0x5d   : > { %630 = vmatprep.subr.mxu0 %v524_v6  ;;  %701 = vmatprep.subr.mxu1 %v526_v7  ;;  %v521_v13 = vld [vmem:[%s1254_s4 + $0x1b0] sm:$0xff]  ;;  %v516_v14 = vld [vmem:[%s1254_s4 + $0x188] sm:$0xff]  ;;  %v518_v15 = vld [vmem:[%s1254_s4 + $0x198] sm:$0xff] }
  0x5e   : > { %631 = vmatpush1.msra.mxu0 %v523_v8  ;;  %702 = vmatpush1.msra.mxu1 %v525_v9  ;;  %v515_v16 = vld [vmem:[%s1254_s4 + $0x180] sm:$0xff]  ;;  %v517_v17 = vld [vmem:[%s1254_s4 + $0x190] sm:$0xff]  ;;  %v512_v18 = vld [vmem:[%s1254_s4 + $0x168] sm:$0xff] }
  0x5f   : > { %632 = vmatprep.subr.mxu0 %v520_v10  ;;  %703 = vmatprep.subr.mxu1 %v522_v11  ;;  %v514_v19 = vld [vmem:[%s1254_s4 + $0x178] sm:$0xff]  ;;  %v511_v20 = vld [vmem:[%s1254_s4 + $0x160] sm:$0xff]  ;;  %v513_v21 = vld [vmem:[%s1254_s4 + $0x170] sm:$0xff] }
  0x60   : > { %633 = vmatpush1.msra.mxu0 %v519_v12  ;;  %704 = vmatpush1.msra.mxu1 %v521_v13  ;;  %v508_v22 = vld [vmem:[%s1254_s4 + $0x148] sm:$0xff]  ;;  %v510_v23 = vld [vmem:[%s1254_s4 + $0x158] sm:$0xff]  ;;  %v507_v24 = vld [vmem:[%s1254_s4 + $0x140] sm:$0xff] }
  0x61   : > { %634 = vmatprep.subr.mxu0 %v516_v14  ;;  %705 = vmatprep.subr.mxu1 %v518_v15  ;;  %v509_v25 = vld [vmem:[%s1254_s4 + $0x150] sm:$0xff]  ;;  %v504_v26 = vld [vmem:[%s1254_s4 + $0x128] sm:$0xff]  ;;  %v506_v27 = vld [vmem:[%s1254_s4 + $0x138] sm:$0xff] }
  0x62   : > { %635 = vmatpush1.msra.mxu0 %v515_v16  ;;  %706 = vmatpush1.msra.mxu1 %v517_v17  ;;  %v503_v28 = vld [vmem:[%s1254_s4 + $0x120] sm:$0xff]  ;;  %v505_v29 = vld [vmem:[%s1254_s4 + $0x130] sm:$0xff]  ;;  %v500_v30 = vld [vmem:[%s1254_s4 + $0x108] sm:$0xff] }
  0x63   : > { %636 = vmatprep.subr.mxu0 %v512_v18  ;;  %707 = vmatprep.subr.mxu1 %v514_v19  ;;  %v502_v31 = vld [vmem:[%s1254_s4 + $0x118] sm:$0xff]  ;;  %v499_v32 = vld [vmem:[%s1254_s4 + $0x100] sm:$0xff]  ;;  %v501_v33 = vld [vmem:[%s1254_s4 + $0x110] sm:$0xff] }
  0x64   : > { %637 = vmatpush1.msra.mxu0 %v511_v20  ;;  %708 = vmatpush1.msra.mxu1 %v513_v21  ;;  %v496_v34 = vld [vmem:[%s1254_s4 + $0xe8] sm:$0xff]  ;;  %v498_v35 = vld [vmem:[%s1254_s4 + $0xf8] sm:$0xff]  ;;  %v495_v36 = vld [vmem:[%s1254_s4 + $0xe0] sm:$0xff] }
  0x65   : > { %638 = vmatprep.subr.mxu0 %v508_v22  ;;  %709 = vmatprep.subr.mxu1 %v510_v23  ;;  %v497_v37 = vld [vmem:[%s1254_s4 + $0xf0] sm:$0xff]  ;;  %v492_v38 = vld [vmem:[%s1254_s4 + $0xc8] sm:$0xff]  ;;  %v494_v39 = vld [vmem:[%s1254_s4 + $0xd8] sm:$0xff] }
  0x66   : > { %639 = vmatpush1.msra.mxu0 %v507_v24  ;;  %710 = vmatpush1.msra.mxu1 %v509_v25  ;;  %v491_v40 = vld [vmem:[%s1254_s4 + $0xc0] sm:$0xff]  ;;  %v493_v41 = vld [vmem:[%s1254_s4 + $0xd0] sm:$0xff]  ;;  %v488_v42 = vld [vmem:[%s1254_s4 + $0xa8] sm:$0xff] }
  0x67   : > { %640 = vmatprep.subr.mxu0 %v504_v26  ;;  %711 = vmatprep.subr.mxu1 %v506_v27  ;;  %v490_v43 = vld [vmem:[%s1254_s4 + $0xb8] sm:$0xff]  ;;  %v487_v44 = vld [vmem:[%s1254_s4 + $0xa0] sm:$0xff]  ;;  %v489_v45 = vld [vmem:[%s1254_s4 + $0xb0] sm:$0xff] }
  0x68   : > { %641 = vmatpush1.msra.mxu0 %v503_v28  ;;  %712 = vmatpush1.msra.mxu1 %v505_v29  ;;  %v484_v46 = vld [vmem:[%s1254_s4 + $0x88] sm:$0xff]  ;;  %v486_v47 = vld [vmem:[%s1254_s4 + $0x98] sm:$0xff]  ;;  %v483_v48 = vld [vmem:[%s1254_s4 + $0x80] sm:$0xff] }
  0x69   : > { %642 = vmatprep.subr.mxu0 %v500_v30  ;;  %713 = vmatprep.subr.mxu1 %v502_v31  ;;  %v485_v49 = vld [vmem:[%s1254_s4 + $0x90] sm:$0xff]  ;;  %v480_v50 = vld [vmem:[%s1254_s4 + $0x68] sm:$0xff]  ;;  %v482_v51 = vld [vmem:[%s1254_s4 + $0x78] sm:$0xff] }
  0x6a   : > { %643 = vmatpush1.msra.mxu0 %v499_v32  ;;  %714 = vmatpush1.msra.mxu1 %v501_v33  ;;  %v479_v52 = vld [vmem:[%s1254_s4 + $0x60] sm:$0xff]  ;;  %v481_v53 = vld [vmem:[%s1254_s4 + $0x70] sm:$0xff]  ;;  %v476_v54 = vld [vmem:[%s1254_s4 + $0x48] sm:$0xff] }
  0x6b   : > { %644 = vmatprep.subr.mxu0 %v496_v34  ;;  %715 = vmatprep.subr.mxu1 %v498_v35  ;;  %v478_v55 = vld [vmem:[%s1254_s4 + $0x58] sm:$0xff]  ;;  %v475_v56 = vld [vmem:[%s1254_s4 + $0x40] sm:$0xff]  ;;  %v477_v57 = vld [vmem:[%s1254_s4 + $0x50] sm:$0xff] }
  0x6c   : > { %645 = vmatpush1.msra.mxu0 %v495_v36  ;;  %716 = vmatpush1.msra.mxu1 %v497_v37  ;;  %v472_v58 = vld [vmem:[%s1254_s4 + $0x28] sm:$0xff]  ;;  %v474_v59 = vld [vmem:[%s1254_s4 + $0x38] sm:$0xff]  ;;  %v471_v60 = vld [vmem:[%s1254_s4 + $0x20] sm:$0xff] }
  0x6d   : > { %646 = vmatprep.subr.mxu0 %v492_v38  ;;  %717 = vmatprep.subr.mxu1 %v494_v39  ;;  %v473_v61 = vld [vmem:[%s1254_s4 + $0x30] sm:$0xff]  ;;  %v468_v62 = vld [vmem:[%s1254_s4 + $0x8] sm:$0xff]  ;;  %v470_v63 = vld [vmem:[%s1254_s4 + $0x18] sm:$0xff] }
  0x6e   : > { %647 = vmatpush1.msra.mxu0 %v491_v40  ;;  %718 = vmatpush1.msra.mxu1 %v493_v41  ;;  %v467_v1 = vld [vmem:[%s1254_s4] sm:$0xff]  ;;  %v469_v2 = vld [vmem:[%s1254_s4 + $0x10] sm:$0xff]  ;;  %v592_v3 = vld [vmem:[%s1254_s4 + $0x3e8] sm:$0xff] }
  0x6f   : > { %648 = vmatprep.subr.mxu0 %v488_v42  ;;  %719 = vmatprep.subr.mxu1 %v490_v43  ;;  %v594_v4 = vld [vmem:[%s1254_s4 + $0x3f8] sm:$0xff]  ;;  %v591_v5 = vld [vmem:[%s1254_s4 + $0x3e0] sm:$0xff]  ;;  %v593_v6 = vld [vmem:[%s1254_s4 + $0x3f0] sm:$0xff] }
  0x70   : > { %649 = vmatpush1.msra.mxu0 %v487_v44  ;;  %720 = vmatpush1.msra.mxu1 %v489_v45  ;;  %v588_v7 = vld [vmem:[%s1254_s4 + $0x3c8] sm:$0xff]  ;;  %v590_v8 = vld [vmem:[%s1254_s4 + $0x3d8] sm:$0xff]  ;;  %v587_v9 = vld [vmem:[%s1254_s4 + $0x3c0] sm:$0xff] }
  0x71   : > { %650 = vmatprep.subr.mxu0 %v484_v46  ;;  %721 = vmatprep.subr.mxu1 %v486_v47  ;;  %v589_v10 = vld [vmem:[%s1254_s4 + $0x3d0] sm:$0xff]  ;;  %v584_v11 = vld [vmem:[%s1254_s4 + $0x3a8] sm:$0xff]  ;;  %v586_v12 = vld [vmem:[%s1254_s4 + $0x3b8] sm:$0xff] }
  0x72   : > { %651 = vmatpush1.msra.mxu0 %v483_v48  ;;  %722 = vmatpush1.msra.mxu1 %v485_v49  ;;  %v583_v13 = vld [vmem:[%s1254_s4 + $0x3a0] sm:$0xff]  ;;  %v585_v14 = vld [vmem:[%s1254_s4 + $0x3b0] sm:$0xff]  ;;  %v580_v15 = vld [vmem:[%s1254_s4 + $0x388] sm:$0xff] }
  0x73   : > { %652 = vmatprep.subr.mxu0 %v480_v50  ;;  %723 = vmatprep.subr.mxu1 %v482_v51  ;;  %v582_v16 = vld [vmem:[%s1254_s4 + $0x398] sm:$0xff]  ;;  %v579_v17 = vld [vmem:[%s1254_s4 + $0x380] sm:$0xff]  ;;  %v581_v18 = vld [vmem:[%s1254_s4 + $0x390] sm:$0xff] }
  0x74   : > { %653 = vmatpush1.msra.mxu0 %v479_v52  ;;  %724 = vmatpush1.msra.mxu1 %v481_v53  ;;  %v576_v19 = vld [vmem:[%s1254_s4 + $0x368] sm:$0xff]  ;;  %v578_v20 = vld [vmem:[%s1254_s4 + $0x378] sm:$0xff]  ;;  %v575_v21 = vld [vmem:[%s1254_s4 + $0x360] sm:$0xff] }
  0x75   : > { %654 = vmatprep.subr.mxu0 %v476_v54  ;;  %725 = vmatprep.subr.mxu1 %v478_v55  ;;  %v577_v22 = vld [vmem:[%s1254_s4 + $0x370] sm:$0xff]  ;;  %v572_v23 = vld [vmem:[%s1254_s4 + $0x348] sm:$0xff]  ;;  %v574_v24 = vld [vmem:[%s1254_s4 + $0x358] sm:$0xff] }
  0x76   : > { %655 = vmatpush1.msra.mxu0 %v475_v56  ;;  %726 = vmatpush1.msra.mxu1 %v477_v57  ;;  %v571_v25 = vld [vmem:[%s1254_s4 + $0x340] sm:$0xff]  ;;  %v573_v26 = vld [vmem:[%s1254_s4 + $0x350] sm:$0xff]  ;;  %v568_v27 = vld [vmem:[%s1254_s4 + $0x328] sm:$0xff] }
  0x77   : > { %656 = vmatprep.subr.mxu0 %v472_v58  ;;  %727 = vmatprep.subr.mxu1 %v474_v59  ;;  %v570_v28 = vld [vmem:[%s1254_s4 + $0x338] sm:$0xff]  ;;  %v567_v29 = vld [vmem:[%s1254_s4 + $0x320] sm:$0xff]  ;;  %v569_v30 = vld [vmem:[%s1254_s4 + $0x330] sm:$0xff] }
  0x78   : > { %657 = vmatpush1.msra.mxu0 %v471_v60  ;;  %728 = vmatpush1.msra.mxu1 %v473_v61  ;;  %v564_v31 = vld [vmem:[%s1254_s4 + $0x308] sm:$0xff]  ;;  %v566_v32 = vld [vmem:[%s1254_s4 + $0x318] sm:$0xff]  ;;  %v563_v33 = vld [vmem:[%s1254_s4 + $0x300] sm:$0xff] }
  0x79   : > { %658 = vmatprep.subr.mxu0 %v468_v62  ;;  %729 = vmatprep.subr.mxu1 %v470_v63  ;;  %v565_v34 = vld [vmem:[%s1254_s4 + $0x310] sm:$0xff]  ;;  %v560_v35 = vld [vmem:[%s1254_s4 + $0x2e8] sm:$0xff]  ;;  %v562_v36 = vld [vmem:[%s1254_s4 + $0x2f8] sm:$0xff] }
  0x7a   : > { %659 = vmatpush1.msra.mxu0 %v467_v1  ;;  %730 = vmatpush1.msra.mxu1 %v469_v2  ;;  %v559_v37 = vld [vmem:[%s1254_s4 + $0x2e0] sm:$0xff]  ;;  %v561_v38 = vld [vmem:[%s1254_s4 + $0x2f0] sm:$0xff]  ;;  %v556_v39 = vld [vmem:[%s1254_s4 + $0x2c8] sm:$0xff] }
  0x7b   : > { %660 = vmatprep.subr.mxu0 %v592_v3  ;;  %731 = vmatprep.subr.mxu1 %v594_v4  ;;  %v558_v40 = vld [vmem:[%s1254_s4 + $0x2d8] sm:$0xff]  ;;  %v555_v41 = vld [vmem:[%s1254_s4 + $0x2c0] sm:$0xff]  ;;  %v557_v42 = vld [vmem:[%s1254_s4 + $0x2d0] sm:$0xff]  ;;  %v597_v4 = vlaneseq }
  0x7c   : > { %661 = vmatpush2.msra.mxu0 %v591_v5  ;;  %732 = vmatpush2.msra.mxu1 %v593_v6  ;;  %v552_v43 = vld [vmem:[%s1254_s4 + $0x2a8] sm:$0xff]  ;;  %v554_v44 = vld [vmem:[%s1254_s4 + $0x2b8] sm:$0xff]  ;;  %v551_v45 = vld [vmem:[%s1254_s4 + $0x2a0] sm:$0xff]  ;;  %v929_v6 = vmov 1983009808  }
  0x7d   : > { %662 = vmatprep.subr.mxu0 %v588_v7  ;;  %733 = vmatprep.subr.mxu1 %v590_v8  ;;  %v553_v46 = vld [vmem:[%s1254_s4 + $0x2b0] sm:$0xff]  ;;  %v548_v47 = vld [vmem:[%s1254_s4 + $0x288] sm:$0xff]  ;;  %v550_v48 = vld [vmem:[%s1254_s4 + $0x298] sm:$0xff]  ;;  %v598_v5 = vshrl.u32 %v597_v4, 7  ;;  %v777_v7 = vunpack.c.l.s4 %v929_v6 }
  0x7e   : > { %663 = vmatpush2.msra.mxu0 %v587_v9  ;;  %734 = vmatpush2.msra.mxu1 %v589_v10  ;;  %v547_v49 = vld [vmem:[%s1254_s4 + $0x280] sm:$0xff]  ;;  %v549_v50 = vld [vmem:[%s1254_s4 + $0x290] sm:$0xff]  ;;  %v544_v51 = vld [vmem:[%s1254_s4 + $0x268] sm:$0xff] }
  0x7f   : > { %664 = vmatprep.subr.mxu0 %v584_v11  ;;  %735 = vmatprep.subr.mxu1 %v586_v12  ;;  %v546_v52 = vld [vmem:[%s1254_s4 + $0x278] sm:$0xff]  ;;  %v543_v53 = vld [vmem:[%s1254_s4 + $0x260] sm:$0xff]  ;;  %v545_v54 = vld [vmem:[%s1254_s4 + $0x270] sm:$0xff]  ;;  %v599_v8 = vsub.s32 0, %v598_v5  ;;  %v607_v9 = vsub.s32 2, %v598_v5  ;;  %v603_v10 = vsub.s32 1, %v598_v5 }
  0x80   : > { %665 = vmatpush2.msra.mxu0 %v583_v13  ;;  %736 = vmatpush2.msra.mxu1 %v585_v14  ;;  %v540_v55 = vld [vmem:[%s1254_s4 + $0x248] sm:$0xff]  ;;  %v542_v56 = vld [vmem:[%s1254_s4 + $0x258] sm:$0xff]  ;;  %v539_v57 = vld [vmem:[%s1254_s4 + $0x240] sm:$0xff]  ;;  %v611_v11 = vsub.s32 3, %v598_v5 }
  0x81   : > { %666 = vmatprep.subr.mxu0 %v580_v15  ;;  %737 = vmatprep.subr.mxu1 %v582_v16  ;;  %v541_v58 = vld [vmem:[%s1254_s4 + $0x250] sm:$0xff]  ;;  %v536_v59 = vld [vmem:[%s1254_s4 + $0x228] sm:$0xff]  ;;  %v538_v60 = vld [vmem:[%s1254_s4 + $0x238] sm:$0xff] }
  0x82   : > { %667 = vmatpush2.msra.mxu0 %v579_v17  ;;  %738 = vmatpush2.msra.mxu1 %v581_v18  ;;  %v535_v61 = vld [vmem:[%s1254_s4 + $0x220] sm:$0xff]  ;;  %v537_v62 = vld [vmem:[%s1254_s4 + $0x230] sm:$0xff]  ;;  %v532_v63 = vld [vmem:[%s1254_s4 + $0x208] sm:$0xff] }
  0x83   : > { %668 = vmatprep.subr.mxu0 %v576_v19  ;;  %739 = vmatprep.subr.mxu1 %v578_v20  ;;  %v534_v1 = vld [vmem:[%s1254_s4 + $0x218] sm:$0xff]  ;;  %v531_v2 = vld [vmem:[%s1254_s4 + $0x200] sm:$0xff]  ;;  %v533_v3 = vld [vmem:[%s1254_s4 + $0x210] sm:$0xff] }
  0x84   : > { %669 = vmatpush2.msra.mxu0 %v575_v21  ;;  %740 = vmatpush2.msra.mxu1 %v577_v22  ;;  %v595_v12 = vld [vmem:[%s458_s8] sm:$0xf] }
  0x85   : > { %670 = vmatprep.subr.mxu0 %v572_v23  ;;  %741 = vmatprep.subr.mxu1 %v574_v24  ;;  %v600_v13 = vrot.slane %v595_v12, %v599_v8  ;;  %v608_v14 = vrot.slane %v595_v12, %v607_v9  ;;  %v604_v15 = vrot.slane %v595_v12, %v603_v10 }
  0x86   : > { %671 = vmatpush2.msra.mxu0 %v571_v25  ;;  %742 = vmatpush2.msra.mxu1 %v573_v26  ;;  %v612_v16 = vrot.slane %v595_v12, %v611_v11 }
  0x87   : > { %672 = vmatprep.subr.mxu0 %v568_v27  ;;  %743 = vmatprep.subr.mxu1 %v570_v28 }
  0x88   : > { %673 = vmatpush2.msra.mxu0 %v567_v29  ;;  %744 = vmatpush2.msra.mxu1 %v569_v30 }
  0x89   : > { %674 = vmatprep.subr.mxu0 %v564_v31  ;;  %745 = vmatprep.subr.mxu1 %v566_v32 }
  0x8a   : > { %675 = vmatpush2.msra.mxu0 %v563_v33  ;;  %746 = vmatpush2.msra.mxu1 %v565_v34 }
  0x8b   : > { %676 = vmatprep.subr.mxu0 %v560_v35  ;;  %747 = vmatprep.subr.mxu1 %v562_v36 }
  0x8c   : > { %677 = vmatpush2.msra.mxu0 %v559_v37  ;;  %748 = vmatpush2.msra.mxu1 %v561_v38 }
  0x8d   : > { %678 = vmatprep.subr.mxu0 %v556_v39  ;;  %749 = vmatprep.subr.mxu1 %v558_v40 }
  0x8e   : > { %679 = vmatpush2.msra.mxu0 %v555_v41  ;;  %750 = vmatpush2.msra.mxu1 %v557_v42 }
  0x8f   : > { %680 = vmatprep.subr.mxu0 %v552_v43  ;;  %751 = vmatprep.subr.mxu1 %v554_v44 }
  0x90   : > { %681 = vmatpush2.msra.mxu0 %v551_v45  ;;  %752 = vmatpush2.msra.mxu1 %v553_v46 }
  0x91   : > { %682 = vmatprep.subr.mxu0 %v548_v47  ;;  %753 = vmatprep.subr.mxu1 %v550_v48 }
  0x92   : > { %683 = vmatpush2.msra.mxu0 %v547_v49  ;;  %754 = vmatpush2.msra.mxu1 %v549_v50 }
  0x93   : > { %684 = vmatprep.subr.mxu0 %v544_v51  ;;  %755 = vmatprep.subr.mxu1 %v546_v52 }
  0x94   : > { %685 = vmatpush2.msra.mxu0 %v543_v53  ;;  %756 = vmatpush2.msra.mxu1 %v545_v54 }
  0x95   : > { %686 = vmatprep.subr.mxu0 %v540_v55  ;;  %757 = vmatprep.subr.mxu1 %v542_v56 }
  0x96   : > { %687 = vmatpush2.msra.mxu0 %v539_v57  ;;  %758 = vmatpush2.msra.mxu1 %v541_v58 }
  0x97   : > { %688 = vmatprep.subr.mxu0 %v536_v59  ;;  %759 = vmatprep.subr.mxu1 %v538_v60 }
  0x98   : > { %689 = vmatpush2.msra.mxu0 %v535_v61  ;;  %760 = vmatpush2.msra.mxu1 %v537_v62 }
  0x99   : > { %690 = vmatprep.subr.mxu0 %v532_v63  ;;  %761 = vmatprep.subr.mxu1 %v534_v1 }
  0x9a   : > { %691 = vmatpush2.msra.mxu0 %v531_v2  ;;  %762 = vmatpush2.msra.mxu1 %v533_v3 }
  0x9b   : > { %693 = vmatmul.mubr.f32.vlgmr.msra.gmra.mxu0 %v1250_v0  ;;  %764 = vmatmul.mubr.f32.vlgmr.msra.gmra.mxu1 %v1250_v0  ;;  %v778_v0 = vunpack.c.0.s8 %v777_v7 }
  0x9d   : > { %v781_v20 = vsub.s32 %v778_v0, %v598_v5 }
 0x15b   : > { %v694_v17 = vpop.f32.mrf.mxu0  ;;  %v765_v18 = vpop.f32.mrf.mxu1 }
 0x15c   : > { %v695_v22 = vadd.f32 %v694_v17, %v600_v13  ;;  %v766_v23 = vadd.f32 %v765_v18, %v608_v14 }
 0x15d   : > { %v696_v19 = vpop.f32.mrf.mxu0  ;;  %v767_v21 = vpop.f32.mrf.mxu1 }
 0x15e   : > { %v697_v24 = vadd.f32 %v696_v19, %v604_v15  ;;  %v768_v25 = vadd.f32 %v767_v21, %v612_v16 }
 0x160   : > { %v774_v26 = vcombine.low %v695_v22, %v697_v24  ;;  %v775_v27 = vcombine.low %v766_v23, %v768_v25 }
 0x162   : > { %v782_v28 = vrot.slane %v774_v26, %v781_v20  ;;  %v789_v29 = vrot.slane %v775_v27, %v781_v20 }
 0x164   : > { %v790_v30 = vcombine.low %v782_v28, %v789_v29 }
 0x166   : > { %792 = vst [vmem:[%s464_s12] sm:$0xff] %v790_v30 }
 0x167 PF: > { %p10_p9 = scmp.ge.s32.totalorder %s967_s16, 4   ;;  %s1412_s12 = smov %s923_s13 }
 0x168   : > { %s1413_s13 = smov %s976_s19  ;;  %s1414_s14 = smov %s967_s16 }
 0x169   :  { %12 = sbr.rel (!%p10_p9) target bundleno = 2 (0x2), region = 93 }

</bundles_post_ra>
